<compile_context>
chip_gen: v6e
topology: v6e:2x2x1
jax: 0.10.0
libtpu: 0.0.40
codegen_flags: <defaults>
</compile_context>

<pallas_src>
import functools

import jax
import jax.numpy as jnp
from jax.experimental import pallas as pl
from jax.experimental.pallas import tpu as pltpu


def _logreg_kernel(x_ref, w_ref, b_ref, o_ref, *, pack):
    # x_ref: (TB, D)  w_ref: (D, C)  b_ref: (1, C)
    # o_ref: (TB//8, 8*C) if pack else (TB, C)
    x = x_ref[...]
    logits = jnp.dot(x, w_ref[...], preferred_element_type=jnp.float32) + b_ref[...]

    # Numerically-stable softmax along the class (last) axis, all in f32.
    m = jnp.max(logits, axis=-1, keepdims=True)
    e = jnp.exp(logits - m)
    denom = jnp.sum(e, axis=-1, keepdims=True)
    probs = (e * pl.reciprocal(denom, approx=False)).astype(o_ref.dtype)

    if pack:
        # Row-major repack (TB, C) -> (TB//8, 8*C): lane-dense stores.
        o_ref[...] = probs.reshape(o_ref.shape)
    else:
        o_ref[...] = probs


def _pick_batch_tile(B, block_b, D, C):
    """Pick batch tile TB and grid size.

    Keeps the double-buffered (TB,D)+(TB,C) f32 working set well under the
    v7x scoped-VMEM budget, and prefers >=4 tiles for non-trivial B so a
    megacore 'parallel' split gives both v7x TensorCores work.
    """
    bytes_per_row = 2 * (D + C) * 4                       # double-buffered f32
    vmem_cap = max(64, ((28 << 20) // bytes_per_row) // 64 * 64)
    block_b = max(64, (min(block_b, vmem_cap) // 64) * 64)
    if B <= 256 and B <= block_b:
        return B, 1                                        # tiny batch: one tile
    tb = min(block_b, ((pl.cdiv(B, 4) + 63) // 64) * 64)   # aim for >=4 tiles
    return tb, pl.cdiv(B, tb)


def _vmem_limit(tb, D, C):
    # Double-buffered x/out tiles + (conservatively double-buffered) W, b,
    # plus headroom for compiler-internal scratch.  Small on every generation.
    need = 2 * tb * (D + C) * 4 + 2 * (D * C + C) * 4
    return int(need) + (4 << 20)


def _forward(x, w_t, b2, *, tb, num_tiles, pack, vmem_limit_bytes):
    B, D = x.shape
    C = w_t.shape[1]
    B_pad = num_tiles * tb

    kernel = functools.partial(_logreg_kernel, pack=pack)

    if pack:
        out_shape = jax.ShapeDtypeStruct((B_pad // 8, C * 8), x.dtype)
        out_spec = pl.BlockSpec((tb // 8, C * 8), lambda i: (i, 0))
    else:
        # Exact-size output; a ragged last block's OOB writes are discarded.
        out_shape = jax.ShapeDtypeStruct((B, C), x.dtype)
        out_spec = pl.BlockSpec((tb, C), lambda i: (i, 0))

    cost = pl.CostEstimate(
        flops=2 * B_pad * D * C,
        transcendentals=B_pad * C,
        bytes_accessed=4 * (B_pad * D + D * C + C + B_pad * C),
    )

    out = pl.pallas_call(
        kernel,
        out_shape=out_shape,
        grid_spec=pltpu.PrefetchScalarGridSpec(
            num_scalar_prefetch=0,
            grid=(num_tiles,),
            in_specs=[
                pl.BlockSpec((tb, D), lambda i: (i, 0)),   # x tile: streams
                pl.BlockSpec((D, C), lambda i: (0, 0)),    # W: VMEM-resident
                pl.BlockSpec((1, C), lambda i: (0, 0)),    # b: VMEM-resident
            ],
            out_specs=out_spec,
        ),
        compiler_params=pltpu.CompilerParams(
            dimension_semantics=("parallel",),             # independent tiles
            vmem_limit_bytes=vmem_limit_bytes,
        ),
        cost_estimate=cost,
    )(x, w_t, b2)

    if pack:
        out = out.reshape(B_pad, C)      # contiguous row-major reshape: free
        if B_pad != B:
            out = out[:B]
    return out


_PACK_OK = {"status": None}              # lazily probed lane-pack support


def batch_logistic_regression(x, w_t, b, *, block_b=16384):
    """softmax(x @ w_t + b, axis=1).

    x:   (B, D) float32
    w_t: (D, C) float32  (nn.Linear weight, pre-transposed)
    b:   (C,)   float32
    """
    B, D = x.shape
    C = w_t.shape[1]
    b2 = b.reshape(1, C)

    tb, num_tiles = _pick_batch_tile(B, block_b, D, C)
    vmem = _vmem_limit(tb, D, C)

    pack = (num_tiles == 1 and tb % 8 == 0) or (num_tiles > 1 and tb % 64 == 0)
    if pack and _PACK_OK["status"] is False:
        pack = False

    if pack:
        try:
            out = _forward(x, w_t, b2, tb=tb, num_tiles=num_tiles, pack=True,
                           vmem_limit_bytes=vmem)
            out = jax.block_until_ready(out)
            _PACK_OK["status"] = True
            return out
        except Exception:
            # In-kernel (TB,16)->(TB/8,128) repack not supported by this
            # Mosaic build; fall back to the plain (TB, C) output layout.
            _PACK_OK["status"] = False

    return _forward(x, w_t, b2, tb=tb, num_tiles=num_tiles, pack=False,
                    vmem_limit_bytes=vmem)


if __name__ == "__main__":
    key = jax.random.PRNGKey(0)
    kx, kw, kb, kx2, kx3 = jax.random.split(key, 5)

    # Shapes consistent with the module: batch=8, input_size=32, classes=16.
    batch, input_size, num_classes = 8, 32, 16

    # nn.Linear-style init: weight (C, D), bias (C,); store weight transposed.
    bound = 1.0 / (input_size ** 0.5)
    w = jax.random.uniform(kw, (num_classes, input_size),
                           minval=-bound, maxval=bound, dtype=jnp.float32)
    b = jax.random.uniform(kb, (num_classes,),
                           minval=-bound, maxval=bound, dtype=jnp.float32)
    w_t = w.T  # (input_size, num_classes)

    def ref_fn(x):
        return jax.nn.softmax(x @ w_t + b[None, :], axis=1)

    # 1) Tiny batch: single full-extent tile, lane-packed epilogue.
    x1 = jax.random.normal(kx, (batch, input_size), dtype=jnp.float32)
    o1 = jax.block_until_ready(batch_logistic_regression(x1, w_t, b))
    assert o1.shape == (batch, num_classes)
    assert jnp.allclose(o1, ref_fn(x1), atol=1e-5, rtol=1e-5)
    assert jnp.allclose(jnp.sum(o1, axis=1), 1.0, atol=1e-5)

    # 2) Non-divisible batch with small tiles: multi-tile grid, ragged last
    #    block (no input padding), packed output sliced back to B rows.
    x2 = jax.random.normal(kx2, (200, input_size), dtype=jnp.float32)
    o2 = jax.block_until_ready(batch_logistic_regression(x2, w_t, b, block_b=64))
    assert o2.shape == (200, num_classes)
    assert jnp.allclose(o2, ref_fn(x2), atol=1e-5, rtol=1e-5)
    assert jnp.allclose(jnp.sum(o2, axis=1), 1.0, atol=1e-5)

    # 3) Larger batch with default auto tiling (>=4 tiles, even division).
    x3 = jax.random.normal(kx3, (4096, input_size), dtype=jnp.float32)
    o3 = jax.block_until_ready(batch_logistic_regression(x3, w_t, b))
    assert o3.shape == (4096, num_classes)
    assert jnp.allclose(o3, ref_fn(x3), atol=1e-5, rtol=1e-5)
    assert jnp.allclose(jnp.sum(o3, axis=1), 1.0, atol=1e-5)

    print("KERNEL_OK")
</pallas_src>

<mosaic_0001>
module attributes {stable_mosaic.version = 11 : i64} {
  func.func @_logreg_kernel(%arg0: i32, %arg1: memref<8x32xf32, #tpu.memory_space<vmem>>, %arg2: memref<32x16xf32, #tpu.memory_space<vmem>>, %arg3: memref<1x16xf32, #tpu.memory_space<vmem>>, %arg4: memref<1x128xf32, #tpu.memory_space<vmem>>) attributes {dimension_semantics = [#tpu.dimension_semantics<parallel>], iteration_bounds = array<i64: 1>, scalar_prefetch = 0 : i64, scratch_operands = 0 : i64, tpu.core_type = #tpu.core_type<tc>, window_params = [{transform_indices = @transform_0, window_bounds = array<i64: 8, 32>}, {pipeline_mode = #tpu.pipeline_mode<synchronous>, transform_indices = @transform_1, window_bounds = array<i64: 32, 16>}, {pipeline_mode = #tpu.pipeline_mode<synchronous>, transform_indices = @transform_2, window_bounds = array<i64: 1, 16>}, {transform_indices = @transform_3, window_bounds = array<i64: 1, 128>}]} {
    %c0 = arith.constant 0 : index
    %c0_0 = arith.constant 0 : index
    %0 = vector.load %arg1[%c0, %c0_0] : memref<8x32xf32, #tpu.memory_space<vmem>>, vector<8x32xf32>
    %c0_1 = arith.constant 0 : index
    %c0_2 = arith.constant 0 : index
    %1 = vector.load %arg2[%c0_1, %c0_2] : memref<32x16xf32, #tpu.memory_space<vmem>>, vector<32x16xf32>
    %cst = arith.constant dense<0.000000e+00> : vector<8x16xf32>
    %2 = tpu.matmul %0, %1, %cst {dimension_numbers = #tpu.dot_dimension_numbers<[1], [0], [0], [1], [0, 0, 1, 1], [], []>} : vector<8x32xf32>, vector<32x16xf32>, vector<8x16xf32> -> vector<8x16xf32>
    %c0_3 = arith.constant 0 : index
    %c0_4 = arith.constant 0 : index
    %3 = vector.load %arg3[%c0_3, %c0_4] : memref<1x16xf32, #tpu.memory_space<vmem>>, vector<1x16xf32>
    %4 = vector.broadcast %3 : vector<1x16xf32> to vector<8x16xf32>
    %5 = arith.addf %2, %4 : vector<8x16xf32>
    %cst_5 = arith.constant dense<0xFF800000> : vector<8xf32>
    %6 = vector.multi_reduction <maximumf>, %5, %cst_5 [1] : vector<8x16xf32> to vector<8xf32>
    %7 = vector.shape_cast %6 : vector<8xf32> to vector<8x1xf32>
    %8 = vector.broadcast %7 : vector<8x1xf32> to vector<8x16xf32>
    %9 = arith.subf %5, %8 : vector<8x16xf32>
    %10 = math.exp %9 : vector<8x16xf32>
    %cst_6 = arith.constant dense<0.000000e+00> : vector<8xf32>
    %11 = vector.multi_reduction <add>, %10, %cst_6 [1] : vector<8x16xf32> to vector<8xf32>
    %12 = vector.shape_cast %11 : vector<8xf32> to vector<8x1xf32>
    %13 = tpu.reciprocal %12 : vector<8x1xf32> -> vector<8x1xf32>
    %14 = vector.broadcast %13 : vector<8x1xf32> to vector<8x16xf32>
    %15 = arith.mulf %10, %14 : vector<8x16xf32>
    %16 = vector.shape_cast %15 : vector<8x16xf32> to vector<1x128xf32>
    %c0_7 = arith.constant 0 : index
    %c0_8 = arith.constant 0 : index
    %17 = vector.load %arg4[%c0_7, %c0_8] : memref<1x128xf32, #tpu.memory_space<vmem>>, vector<1x128xf32>
    tpu.vector_store %arg4[%c0_7, %c0_8], %16 {strides = array<i32>} : memref<1x128xf32, #tpu.memory_space<vmem>>, vector<1x128xf32>,
    return
  }
  func.func @transform_0(%arg0: i32) -> (i32, i32) {
    %c0_i32 = arith.constant 0 : i32
    %c0_i32_0 = arith.constant 0 : i32
    return %arg0, %c0_i32 : i32, i32
  }
  func.func @transform_1(%arg0: i32) -> (i32, i32) {
    %c0_i32 = arith.constant 0 : i32
    %c0_i32_0 = arith.constant 0 : i32
    %c0_i32_1 = arith.constant 0 : i32
    return %c0_i32, %c0_i32_0 : i32, i32
  }
  func.func @transform_2(%arg0: i32) -> (i32, i32) {
    %c0_i32 = arith.constant 0 : i32
    %c0_i32_0 = arith.constant 0 : i32
    %c0_i32_1 = arith.constant 0 : i32
    return %c0_i32, %c0_i32_0 : i32, i32
  }
  func.func @transform_3(%arg0: i32) -> (i32, i32) {
    %c0_i32 = arith.constant 0 : i32
    %c0_i32_0 = arith.constant 0 : i32
    return %arg0, %c0_i32 : i32, i32
  }
}

module attributes {stable_mosaic.version = 11 : i64} {
  func.func @_logreg_kernel(%arg0: i32, %arg1: memref<8x32xf32, #tpu.memory_space<vmem>>, %arg2: memref<32x16xf32, #tpu.memory_space<vmem>>, %arg3: memref<1x16xf32, #tpu.memory_space<vmem>>, %arg4: memref<8x16xf32, #tpu.memory_space<vmem>>) attributes {dimension_semantics = [#tpu.dimension_semantics<parallel>], iteration_bounds = array<i64: 1>, scalar_prefetch = 0 : i64, scratch_operands = 0 : i64, tpu.core_type = #tpu.core_type<tc>, window_params = [{transform_indices = @transform_0, window_bounds = array<i64: 8, 32>}, {pipeline_mode = #tpu.pipeline_mode<synchronous>, transform_indices = @transform_1, window_bounds = array<i64: 32, 16>}, {pipeline_mode = #tpu.pipeline_mode<synchronous>, transform_indices = @transform_2, window_bounds = array<i64: 1, 16>}, {transform_indices = @transform_3, window_bounds = array<i64: 8, 16>}]} {
    %c0 = arith.constant 0 : index
    %c0_0 = arith.constant 0 : index
    %0 = vector.load %arg1[%c0, %c0_0] : memref<8x32xf32, #tpu.memory_space<vmem>>, vector<8x32xf32>
    %c0_1 = arith.constant 0 : index
    %c0_2 = arith.constant 0 : index
    %1 = vector.load %arg2[%c0_1, %c0_2] : memref<32x16xf32, #tpu.memory_space<vmem>>, vector<32x16xf32>
    %cst = arith.constant dense<0.000000e+00> : vector<8x16xf32>
    %2 = tpu.matmul %0, %1, %cst {dimension_numbers = #tpu.dot_dimension_numbers<[1], [0], [0], [1], [0, 0, 1, 1], [], []>} : vector<8x32xf32>, vector<32x16xf32>, vector<8x16xf32> -> vector<8x16xf32>
    %c0_3 = arith.constant 0 : index
    %c0_4 = arith.constant 0 : index
    %3 = vector.load %arg3[%c0_3, %c0_4] : memref<1x16xf32, #tpu.memory_space<vmem>>, vector<1x16xf32>
    %4 = vector.broadcast %3 : vector<1x16xf32> to vector<8x16xf32>
    %5 = arith.addf %2, %4 : vector<8x16xf32>
    %cst_5 = arith.constant dense<0xFF800000> : vector<8xf32>
    %6 = vector.multi_reduction <maximumf>, %5, %cst_5 [1] : vector<8x16xf32> to vector<8xf32>
    %7 = vector.shape_cast %6 : vector<8xf32> to vector<8x1xf32>
    %8 = vector.broadcast %7 : vector<8x1xf32> to vector<8x16xf32>
    %9 = arith.subf %5, %8 : vector<8x16xf32>
    %10 = math.exp %9 : vector<8x16xf32>
    %cst_6 = arith.constant dense<0.000000e+00> : vector<8xf32>
    %11 = vector.multi_reduction <add>, %10, %cst_6 [1] : vector<8x16xf32> to vector<8xf32>
    %12 = vector.shape_cast %11 : vector<8xf32> to vector<8x1xf32>
    %13 = tpu.reciprocal %12 : vector<8x1xf32> -> vector<8x1xf32>
    %14 = vector.broadcast %13 : vector<8x1xf32> to vector<8x16xf32>
    %15 = arith.mulf %10, %14 : vector<8x16xf32>
    %c0_7 = arith.constant 0 : index
    %c0_8 = arith.constant 0 : index
    %16 = vector.load %arg4[%c0_7, %c0_8] : memref<8x16xf32, #tpu.memory_space<vmem>>, vector<8x16xf32>
    tpu.vector_store %arg4[%c0_7, %c0_8], %15 {strides = array<i32>} : memref<8x16xf32, #tpu.memory_space<vmem>>, vector<8x16xf32>,
    return
  }
  func.func @transform_0(%arg0: i32) -> (i32, i32) {
    %c0_i32 = arith.constant 0 : i32
    %c0_i32_0 = arith.constant 0 : i32
    return %arg0, %c0_i32 : i32, i32
  }
  func.func @transform_1(%arg0: i32) -> (i32, i32) {
    %c0_i32 = arith.constant 0 : i32
    %c0_i32_0 = arith.constant 0 : i32
    %c0_i32_1 = arith.constant 0 : i32
    return %c0_i32, %c0_i32_0 : i32, i32
  }
  func.func @transform_2(%arg0: i32) -> (i32, i32) {
    %c0_i32 = arith.constant 0 : i32
    %c0_i32_0 = arith.constant 0 : i32
    %c0_i32_1 = arith.constant 0 : i32
    return %c0_i32, %c0_i32_0 : i32, i32
  }
  func.func @transform_3(%arg0: i32) -> (i32, i32) {
    %c0_i32 = arith.constant 0 : i32
    %c0_i32_0 = arith.constant 0 : i32
    return %arg0, %c0_i32 : i32, i32
  }
}

</mosaic_0001>

<bundles_post_ra>
// kernel: tpu_custom_call.1
= control target key start
LH: loop header
LB: loop body
LE: loop exit
PB: predicated region body
PF: predicated region fallthrough
CT: control target
= control target key end

     0   :  { %v175_v1 = vmov 0.0   ;;  %vm176_vm0 = vmmov 0   ;;  %s222_s0 = inlined_call_operand.vmem [shape: f32[8,32], index: 0, kind: input, shape index: {}]   ;;  %s223_s1 = inlined_call_operand.vmem [shape: f32[32,16], index: 1, kind: input, shape index: {}]   ;;  %s224_s2 = inlined_call_operand.vmem [shape: f32[1,16], index: 2, kind: input, shape index: {}]   ;;  %s225_s3 = inlined_call_operand.hbm [shape: f32[8,16], index: 3, kind: output, shape index: {}]  }
   0x1   :  { %v19_v0 = vld [vmem:[%s223_s1 + $0x18] sm:$0xff]  ;;  %135 = vmatprep.subr.mxu0 %v175_v1  ;;  %v18_v2 = vld [vmem:[%s223_s1 + $0x10] sm:$0xff]  ;;  %143 = vmatprep.mubr.msk.f32.mxu0 %vm176_vm0, %v175_v1 }
   0x2   :  { %136 = vmatpush3.msra.mxu0 %v19_v0 }
   0x3   :  { %8 = vsyncpa [#allocation3], 0  ;;  %137 = vmatprep.subr.mxu0 %v175_v1  ;;  %v17_v3 = vld [vmem:[%s223_s1 + $0x8] sm:$0xff]  ;;  %v16_v4 = vld [vmem:[%s223_s1] sm:$0xff]  ;;  %vm27_vm1 = vcmask 261120   ;;  %vm101_vm2 = vcmask 130048  }
   0x4   :  { %138 = vmatpush3.msra.mxu0 %v18_v2  ;;  %v15_v5 = vld [vmem:[%s222_s0] sm:$0xff]  ;;  %s177_s0 = smov [#allocation2]  }
   0x5   :  { %139 = vmatprep.subr.mxu0 %v175_v1  ;;  %v128_v6 = vld [vmem:[%s224_s2] ss:$0 sm:$0xff]  ;;  %s120_s1 = sshll.u32 %s177_s0, 4  ;;  %s121_s1 = int_to_ptr.vmem [resolvable:$true] %s120_s1 }
   0x6   :  { %140 = vmatpush3.msra.mxu0 %v17_v3  ;;  %s153_s2 = scalar_lea.vmem %s121_s1, 128  ;;  %p158_p1 = scmp.lt.s32.totalorder %s121_s1, %s121_s1 }
   0x7   :  { %141 = vmatprep.subr.mxu0 %v175_v1  ;;  %p154_p0 = scmp.ne.s32.totalorder %s121_s1, %s153_s2  ;;  %p159_p2 = scmp.lt.s32.totalorder %s153_s2, %s153_s2 }
   0x8   :  { %142 = vmatpush3.msra.mxu0 %v16_v4 }
   0x9   :  { %144 = vmatmul.mubr.msk.f32.vlgmr.msra.gmra.mxu0 %vm27_vm1, %v15_v5  ;;  %p160_p3 = por %p159_p2, %p158_p1 }
   0xb   :  { %p161_p4 = pnand %p160_p3, %p154_p0 }
  0xc9   :  { %v97_v7 = vpop.f32.mrf.mxu0 }
  0xca   :  { %v98_v8 = vadd.f32 %v128_v6, %v97_v7 }
  0xcb   :  { %v145_v9 = vpop.f32.mrf.mxu0 }
  0xcc   :  { %v102_v10 = vsel %vm101_vm2, %v98_v8, -inf }
  0xcd   :  { %103 = vmax.xlane.f32.xlu0 %v102_v10 }
 0x156   :  { %v104_v11 = vpop.xlane.xlu0 %103 }
 0x157   :  { %v105_v12 = vsub.f32 %v98_v8, %v104_v11 }
 0x159   :  { %v106_v13 = vmul.f32 1.442695, %v105_v12 }
 0x15b   :  { %149 = vpow2.f32 %v106_v13 }
 0x168   :  { %v150_v14 = vpop.eup %149 }
 0x169   :  { %v108_v15 = vsel %vm101_vm2, %v150_v14, 0.0 }
 0x16a   :  { %109 = vadd.xlane.f32.xlu0 %v108_v15 }
 0x1f3   :  { %v110_v16 = vpop.xlane.xlu0 %109 }
 0x1f4   :  { %151 = vrcp.f32 %v110_v16 }
 0x201   :  { %v152_v17 = vpop.eup %151 }
 0x202   :  { %v112_v18 = vmul.f32 %v152_v17, %v150_v14 }
 0x204   :  { %113 = vst.msk [vmem:[#allocation2] sm:$0xff] %vm101_vm2, %v112_v18 }
 0x205   :  { %164 = shalt.err (!%p161_p4)
}
 0x206   :  { %123 = dma.vmem_to_hbm [thread:$0]  %s121_s1, 128, %s225_s3, [#allocation3]  }
 0x207   :  { %173 = dma.done.wait [#allocation3], 128  }
 0x208   :  { %174 = vsyncadd [#allocation3], 4294967168 }
 0x209   :  { %127 = vsyncpa [#allocation3], 1 }

</bundles_post_ra>
